<compile_context>
chip_gen: v7x
topology: tpu7x:2x2x1
jax: 0.10.0
libtpu: 0.0.40
codegen_flags: <defaults>
</compile_context>

<pallas_src>
import functools
import math

import jax
import jax.numpy as jnp
from jax import lax
from jax.experimental import pallas as pl
from jax.experimental.pallas import tpu as pltpu


def _pick_q_tile(T):
    """Largest convenient query-tile size that divides T (multiple of 8)."""
    for t in (256, 128, 64, 32, 16, 8):
        if T % t == 0:
            return t
    return T


def head_kernel(x_ref, wqkv_ref, o_ref, *, H, tq):
    # x_ref:    (1, T, C)  f32  -- one batch element per grid step
    # wqkv_ref: (C, Wn)    bf16 -- packed [Wq*scale | Wk | Wv], zero-padded to
    #                              Wn = round_up(3*H, 128) lanes
    # o_ref:    (1, T, H)  bf16
    x = x_ref[0].astype(jnp.bfloat16)                       # cast in-kernel
    T = x.shape[0]

    # Fused QKV projection: one bf16 MXU matmul, f32 accumulation.
    qkv = jnp.dot(x, wqkv_ref[...],
                  preferred_element_type=jnp.float32)       # (T, Wn) f32

    # Static lane slices out of the compact slab (scale already folded in Wq).
    q = qkv[:, 0 * H:1 * H].astype(jnp.bfloat16)            # (T, H)
    k = qkv[:, 1 * H:2 * H].astype(jnp.bfloat16)            # (T, H)
    v = qkv[:, 2 * H:3 * H].astype(jnp.bfloat16)            # (T, H)

    n_q = T // tq
    for qi in range(n_q):                                   # static unroll
        r0 = qi * tq
        kv_len = r0 + tq          # causal: keys strictly after this q tile are
                                  # fully masked -> never computed.
        q_t = q[r0:r0 + tq]                                 # (tq, H)
        k_p = k[:kv_len]                                    # (kv_len, H)
        v_p = v[:kv_len]                                    # (kv_len, H)

        # Scores: contract last dims -> MXU consumes k transposed directly.
        s = lax.dot_general(q_t, k_p, (((1,), (1,)), ((), ())),
                            preferred_element_type=jnp.float32)  # (tq, kv_len)

        # Causal mask via broadcasted (tq,1) >= (1,kv_len) compare; only the
        # diagonal block is actually affected.  Large finite negative (not
        # -inf) keeps the kernel NaN-safe if extra padding masks are added.
        row = lax.broadcasted_iota(jnp.int32, (tq, 1), 0) + r0
        col = lax.broadcasted_iota(jnp.int32, (1, kv_len), 1)
        s = jnp.where(row >= col, s, -1e30)

        # Numerically stable softmax; reciprocal goes to the (idle) EUP slot.
        m = jnp.max(s, axis=-1, keepdims=True)
        e = jnp.exp(s - m)
        p = e * pl.reciprocal(jnp.sum(e, axis=-1, keepdims=True), approx=True)

        out_t = jnp.dot(p.astype(jnp.bfloat16), v_p,
                        preferred_element_type=jnp.float32)      # (tq, H)
        o_ref[0, pl.ds(r0, tq), :] = out_t.astype(o_ref.dtype)


def pack_qkv_weights(wq, wk, wv, scale):
    """One-time init: pack [Wq*scale | Wk | Wv] into a lane-dense bf16 slab.

    The 1/sqrt(C) score scale is folded into the Wq columns (free), and the
    slab is padded as a whole to the next multiple of 128 lanes (not per part)
    so the projection matmul's N dim stays as small as possible.
    """
    C, H = wq.shape
    n = 3 * H
    wn = max(128, ((n + 127) // 128) * 128)
    packed = jnp.concatenate([wq * scale, wk, wv], axis=1)
    packed = jnp.pad(packed, ((0, 0), (0, wn - n)))
    return packed.astype(jnp.bfloat16)


def head_forward(x, wqkv, head_size):
    """x: (B, T, C) f32; wqkv: pre-packed (C, Wn) bf16 -> (B, T, head_size) bf16.

    Matches PyTorch Head.forward: softmax((xWq)(xWk)^T / sqrt(C)) @ (xWv) with
    a causal (tril) mask.  Note the module scales by sqrt(C) = n_embed, not
    sqrt(head_size); we preserve that.
    """
    B, T, C = x.shape
    wn = wqkv.shape[1]
    tq = _pick_q_tile(T)

    return pl.pallas_call(
        functools.partial(head_kernel, H=head_size, tq=tq),
        out_shape=jax.ShapeDtypeStruct((B, T, head_size), jnp.bfloat16),
        grid_spec=pltpu.PrefetchScalarGridSpec(
            num_scalar_prefetch=0,
            grid=(B,),
            in_specs=[
                pl.BlockSpec((1, T, C), lambda b: (b, 0, 0)),
                pl.BlockSpec((C, wn), lambda b: (0, 0)),
            ],
            out_specs=pl.BlockSpec((1, T, head_size), lambda b: (b, 0, 0)),
        ),
        compiler_params=pltpu.CompilerParams(
            dimension_semantics=("parallel",)),
    )(x, wqkv)


def head_reference(x, wq, wk, wv):
    """Plain-JAX f32 reference mirroring the PyTorch forward."""
    B, T, C = x.shape
    q = x @ wq
    k = x @ wk
    v = x @ wv
    w = jnp.einsum("bth,bsh->bts", q, k) / math.sqrt(C)
    mask = jnp.tril(jnp.ones((T, T), dtype=bool))
    w = jnp.where(mask, w, -jnp.inf)
    w = jax.nn.softmax(w, axis=-1)
    return jnp.einsum("bts,bsh->bth", w, v)


if __name__ == "__main__":
    # Small shapes consistent with the module (n_embed-style C, head_size H,
    # seq T <= block_size), kept tile-friendly.
    B, T, C, H = 2, 64, 128, 32

    key = jax.random.PRNGKey(0)
    kx, kq, kk, kv = jax.random.split(key, 4)

    x = jax.random.normal(kx, (B, T, C), dtype=jnp.float32)
    # Deterministic Linear-style init (uniform in +-1/sqrt(fan_in)), stored as (C, H).
    bound = 1.0 / math.sqrt(C)
    wq = jax.random.uniform(kq, (C, H), jnp.float32, -bound, bound)
    wk = jax.random.uniform(kk, (C, H), jnp.float32, -bound, bound)
    wv = jax.random.uniform(kv, (C, H), jnp.float32, -bound, bound)

    # Weight packing happens once at init, outside the forward/benchmark path.
    wqkv = pack_qkv_weights(wq, wk, wv, scale=1.0 / math.sqrt(C))
    wqkv = jax.block_until_ready(wqkv)

    out = head_forward(x, wqkv, H)
    out = jax.block_until_ready(out)

    ref = head_reference(x, wq, wk, wv)
    assert out.shape == (B, T, H)
    assert out.dtype == jnp.bfloat16
    # bf16 MXU matmuls with f32 accumulation + bf16 output: bf16 tolerance.
    assert jnp.allclose(out.astype(jnp.float32), ref, atol=2e-2, rtol=2e-2), \
        "mismatch vs reference"

    print("KERNEL_OK")
</pallas_src>

<mosaic_0001>
module attributes {stable_mosaic.version = 11 : i64} {
  func.func @head_kernel(%arg0: i32, %arg1: memref<1x64x128xf32, #tpu.memory_space<vmem>>, %arg2: memref<128x128xbf16, #tpu.memory_space<vmem>>, %arg3: memref<1x64x32xbf16, #tpu.memory_space<vmem>>) attributes {dimension_semantics = [#tpu.dimension_semantics<parallel>], iteration_bounds = array<i64: 2>, scalar_prefetch = 0 : i64, scratch_operands = 0 : i64, tpu.core_type = #tpu.core_type<tc>, window_params = [{transform_indices = @transform_0, window_bounds = array<i64: 1, 64, 128>}, {pipeline_mode = #tpu.pipeline_mode<synchronous>, transform_indices = @transform_1, window_bounds = array<i64: 128, 128>}, {transform_indices = @transform_2, window_bounds = array<i64: 1, 64, 32>}]} {
    %c0 = arith.constant 0 : index
    %c0_0 = arith.constant 0 : index
    %c0_1 = arith.constant 0 : index
    %0 = vector.load %arg1[%c0, %c0_0, %c0_1] : memref<1x64x128xf32, #tpu.memory_space<vmem>>, vector<1x64x128xf32>
    %1 = vector.shape_cast %0 : vector<1x64x128xf32> to vector<64x128xf32>
    %2 = arith.truncf %1 : vector<64x128xf32> to vector<64x128xbf16>
    %c0_2 = arith.constant 0 : index
    %c0_3 = arith.constant 0 : index
    %3 = vector.load %arg2[%c0_2, %c0_3] : memref<128x128xbf16, #tpu.memory_space<vmem>>, vector<128x128xbf16>
    %cst = arith.constant dense<0.000000e+00> : vector<64x128xf32>
    %4 = tpu.matmul %2, %3, %cst {dimension_numbers = #tpu.dot_dimension_numbers<[1], [0], [0], [1], [0, 0, 1, 1], [], []>} : vector<64x128xbf16>, vector<128x128xbf16>, vector<64x128xf32> -> vector<64x128xf32>
    %5 = vector.extract_strided_slice %4 {offsets = [0, 0], sizes = [64, 32], strides = [1, 1]} : vector<64x128xf32> to vector<64x32xf32>
    %6 = arith.truncf %5 : vector<64x32xf32> to vector<64x32xbf16>
    %7 = vector.extract_strided_slice %4 {offsets = [0, 32], sizes = [64, 32], strides = [1, 1]} : vector<64x128xf32> to vector<64x32xf32>
    %8 = arith.truncf %7 : vector<64x32xf32> to vector<64x32xbf16>
    %9 = vector.extract_strided_slice %4 {offsets = [0, 64], sizes = [64, 32], strides = [1, 1]} : vector<64x128xf32> to vector<64x32xf32>
    %10 = arith.truncf %9 : vector<64x32xf32> to vector<64x32xbf16>
    %cst_4 = arith.constant dense<0.000000e+00> : vector<64x64xf32>
    %11 = tpu.matmul %6, %8, %cst_4 {dimension_numbers = #tpu.dot_dimension_numbers<[1], [1], [0], [0], [0, 0, 1, 0], [], []>} : vector<64x32xbf16>, vector<64x32xbf16>, vector<64x64xf32> -> vector<64x64xf32>
    %12 = tpu.iota {dimensions = array<i32: 0>} : vector<64x1xi32>
    %c0_i32 = arith.constant 0 : i32
    %13 = vector.broadcast %c0_i32 : i32 to vector<64x1xi32>
    %14 = arith.addi %12, %13 : vector<64x1xi32>
    %15 = tpu.iota {dimensions = array<i32: 1>} : vector<1x64xi32>
    %16 = vector.broadcast %14 : vector<64x1xi32> to vector<64x64xi32>
    %17 = vector.broadcast %15 : vector<1x64xi32> to vector<64x64xi32>
    %18 = arith.cmpi sge, %16, %17 : vector<64x64xi32>
    %cst_5 = arith.constant -1.000000e+30 : f32
    %19 = vector.broadcast %cst_5 : f32 to vector<64x64xf32>
    %20 = arith.select %18, %11, %19 : vector<64x64xi1>, vector<64x64xf32>
    %cst_6 = arith.constant dense<0xFF800000> : vector<64xf32>
    %21 = vector.multi_reduction <maximumf>, %20, %cst_6 [1] : vector<64x64xf32> to vector<64xf32>
    %22 = vector.shape_cast %21 : vector<64xf32> to vector<64x1xf32>
    %23 = vector.broadcast %22 : vector<64x1xf32> to vector<64x64xf32>
    %24 = arith.subf %20, %23 : vector<64x64xf32>
    %25 = math.exp %24 : vector<64x64xf32>
    %cst_7 = arith.constant dense<0.000000e+00> : vector<64xf32>
    %26 = vector.multi_reduction <add>, %25, %cst_7 [1] : vector<64x64xf32> to vector<64xf32>
    %27 = vector.shape_cast %26 : vector<64xf32> to vector<64x1xf32>
    %28 = tpu.reciprocal %27 {approx = true} : vector<64x1xf32> -> vector<64x1xf32>
    %29 = vector.broadcast %28 : vector<64x1xf32> to vector<64x64xf32>
    %30 = arith.mulf %25, %29 : vector<64x64xf32>
    %31 = arith.truncf %30 : vector<64x64xf32> to vector<64x64xbf16>
    %cst_8 = arith.constant dense<0.000000e+00> : vector<64x32xf32>
    %32 = tpu.matmul %31, %10, %cst_8 {dimension_numbers = #tpu.dot_dimension_numbers<[1], [0], [0], [1], [0, 0, 1, 1], [], []>} : vector<64x64xbf16>, vector<64x32xbf16>, vector<64x32xf32> -> vector<64x32xf32>
    %33 = arith.truncf %32 : vector<64x32xf32> to vector<64x32xbf16>
    %c0_9 = arith.constant 0 : index
    %c0_10 = arith.constant 0 : index
    %c0_11 = arith.constant 0 : index
    %34 = vector.load %arg3[%c0_9, %c0_10, %c0_11] : memref<1x64x32xbf16, #tpu.memory_space<vmem>>, vector<1x64x32xbf16>
    %35 = vector.shape_cast %34 : vector<1x64x32xbf16> to vector<64x32xbf16>
    %36 = vector.shape_cast %33 : vector<64x32xbf16> to vector<1x64x32xbf16>
    tpu.vector_store %arg3[%c0_9, %c0_10, %c0_11], %36 {strides = array<i32>} : memref<1x64x32xbf16, #tpu.memory_space<vmem>>, vector<1x64x32xbf16>,
    return
  }
  func.func @transform_0(%arg0: i32) -> (i32, i32, i32) {
    %c0_i32 = arith.constant 0 : i32
    %c0_i32_0 = arith.constant 0 : i32
    %c0_i32_1 = arith.constant 0 : i32
    return %arg0, %c0_i32, %c0_i32_0 : i32, i32, i32
  }
  func.func @transform_1(%arg0: i32) -> (i32, i32) {
    %c0_i32 = arith.constant 0 : i32
    %c0_i32_0 = arith.constant 0 : i32
    %c0_i32_1 = arith.constant 0 : i32
    return %c0_i32, %c0_i32_0 : i32, i32
  }
  func.func @transform_2(%arg0: i32) -> (i32, i32, i32) {
    %c0_i32 = arith.constant 0 : i32
    %c0_i32_0 = arith.constant 0 : i32
    %c0_i32_1 = arith.constant 0 : i32
    return %arg0, %c0_i32, %c0_i32_0 : i32, i32, i32
  }
}

</mosaic_0001>

<bundles_post_ra>
// kernel: tpu_custom_call.1
= control target key start
LH: loop header
LB: loop body
LE: loop exit
PB: predicated region body
PF: predicated region fallthrough
CT: control target
= control target key end

     0   :  { %7 = vsyncpa [#allocation3], 0  ;;  %s1343_s0 = inlined_call_operand.hbm [shape: f32[2,64,128], index: 0, kind: input, shape index: {}]   ;;  %s1344_s1 = inlined_call_operand.hbm [shape: bf16[128,128], index: 1, kind: input, shape index: {}]   ;;  %s1345_s2 = inlined_call_operand.vmem [shape: bf16[2,64,32], index: 2, kind: output, shape index: {}]  }
   0x1   :  { %9 = vsyncpa [#allocation3 + $0x1], 0 }
   0x2   :  { %10 = vsyncpa [#allocation5], 0  ;;  %s1115_s9 = smov 0   ;;  %s1117_s10 = smov 0  }
   0x3   :  { %s1119_s11 = smov 0   ;;  %s1121_s12 = smov 0  }
   0x4 LB: > { %s1134_s13 = sadd.s32 4294967295, %s1090_s12   ;;  %p36_p0 = scmp.ne.s32.totalorder %s1082_s10, %s1078_s9  ;;  %s1090_s12 = sphi %s1121_s12, %s1360_s12   ;;  %s1086_s11 = sphi %s1119_s11, %s1359_s11   ;;  %s1082_s10 = sphi %s1117_s10, %s1358_s10   ;;  %s1078_s9 = sphi %s1115_s9, %s1357_s9  }
   0x5   : > { %p1346_p1 = scmp.eq.s32.totalorder %s1134_s13, 0  ;;  %p755_p2 = scmp.ge.s32.totalorder %s1090_s12, 1 }
   0x6   : > { %p94_p3 = scmp.lt.s32.totalorder %s1090_s12, 3  ;;  %s1092_s16 = smov [#allocation4]  }
   0x7   : > { %p1142_p4 = por %p1346_p1, %p36_p0  ;;  %s106_s17 = sshll.u32 %s1092_s16, 4  ;;  %s107_s17 = int_to_ptr.vmem [resolvable:$true] %s106_s17 }
   0x8   : > { %p1146_p5 = pnand %p755_p2, %p94_p3  ;;  %s1159_s19 = sadd.s32 1, %s1090_s12  }
   0x9   : > { %s1349_s14 = scalar_select %p1142_p4, 1, 0 }
   0xa   : > { %s1350_s15 = scalar_select %p1146_p5, 1, 0 }
   0xb   : > { %p904_p6 = pneg %p1146_p5  ;;  %s23_s20 = sadd.s32 1, %s1086_s11 }
   0xc   : > { %s20_s21 = ssub.s32 %s1090_s12, %s1159_s19  ;;  %s994_s24 = scalar_lea.hbm %s1344_s1, 1024 }
   0xd   : > { %p1154_p7 = pnand %p904_p6, %p1346_p1  ;;  %p995_p8 = scmp.ne.s32.totalorder %s1344_s1, %s994_s24 }
   0xe   : > { %p1001_p12 = scmp.lt.u32.totalorder %s994_s24, %s1344_s1 }
   0xf   : > { %p996_p9 = pneg %p1154_p7 }
  0x11   : > { %p997_p10 = pnand %p996_p9, %p995_p8 }
  0x13   : > { %p998_p11 = pneg %p997_p10 }
  0x15   : > { %p1003_p13 = pnand %p1001_p12, %p998_p11 }
  0x17   : > { %1006 = shalt.err (!%p1003_p13)
}
  0x18   : > { %s1007_s29 = scalar_lea.vmem %s107_s17, 1024  ;;  %p1015_p6 = scmp.lt.s32.totalorder %s107_s17, %s107_s17 }
  0x19   : > { %p1008_p0 = scmp.ne.s32.totalorder %s107_s17, %s1007_s29  ;;  %p1016_p1 = scmp.lt.s32.totalorder %s1007_s29, %s1007_s29 }
  0x1b   : > { %p1010_p2 = pnand %p1008_p0, %p996_p9  ;;  %p1017_p4 = por %p1016_p1, %p1015_p6 }
  0x1d   : > { %p1011_p3 = pneg %p1010_p2 }
  0x1f   : > { %p1018_p5 = pnand %p1017_p4, %p1011_p3 }
  0x21   : > { %1021 = shalt.err (!%p1018_p5)
}
  0x22   : > { %s1093_s30 = smov 64   ;;  %s1094_s3 = smov 4  }
  0x23   : > { %907 = dma.hbm_to_vmem [thread:$0]  (!%p1154_p7), %s1344_s1, 1024, %s107_s17, [#allocation5], %s1093_s30, %s1093_s30, %s1094_s3  }
  0x24   : > { %p21_p8 = scmp.eq.s32.totalorder %s20_s21, 0  ;;  %p30_p9 = scmp.ne.s32.totalorder %s1086_s11, %s1082_s10 }
  0x25   : > { %p31_p1 = scmp.eq.s32.totalorder %s1090_s12, 0  ;;  %p913_p4 = scmp.lt.s32.totalorder %s1090_s12, 2 }
  0x26   : > { %s1185_s6 = scalar_select %p21_p8, %s1086_s11, %s23_s20  }
  0x27   : > { %p32_p5 = por %p31_p1, %p30_p9  ;;  %s120_s7 = sand.u32 1, %s1086_s11  }
  0x28   : > { %s758_s8 = sshll.u32 %s120_s7, 6  ;;  %s792_s9 = sshll.u32 %s1090_s12, 10 }
  0x29   : > { %s1192_s23 = scalar_lea.hbm %s1343_s0, %s792_s9  ;;  %s124_s17 = scalar_lea.vmem [#allocation2], %s758_s8 }
  0x2a   : > { %s131_s18 = sshll.u32 %s124_s17, 4  ;;  %p1196_p7 = pnand %p913_p4, %p32_p5  ;;  %s1194_s18 = int_to_ptr.vmem [resolvable:$true] %s131_s18 }
  0x2b   : > { %s1200_s12 = scalar_lea.sflag [#allocation3], %s120_s7  ;;  %s1022_s21 = scalar_lea.hbm %s1192_s23, 1024 }
  0x2c   : > { %p1023_p10 = scmp.ne.s32.totalorder %s1192_s23, %s1022_s21  ;;  %p1024_p11 = pneg %p1196_p7 }
  0x2d   : > { %s1027_s26 = scalar_lea.hbm %s1343_s0, 2048  ;;  %p1028_p0 = scmp.lt.u32.totalorder %s1192_s23, %s1343_s0 }
  0x2e   : > { %p1025_p12 = pnand %p1024_p11, %p1023_p10  ;;  %p1029_p2 = scmp.lt.u32.totalorder %s1027_s26, %s1022_s21 }
  0x2f   : > { %p1031_p6 = scmp.lt.u32.totalorder %s1022_s21, %s1192_s23 }
  0x30   : > { %p1026_p13 = pneg %p1025_p12  ;;  %p1030_p3 = por %p1029_p2, %p1028_p0 }
  0x32   : > { %p1032_p8 = por %p1031_p6, %p1030_p3 }
  0x34   : > { %p1033_p9 = pnand %p1032_p8, %p1026_p13 }
  0x36   : > { %1036 = shalt.err (!%p1033_p9)
}
  0x37   : > { %s1037_s29 = scalar_lea.vmem %s1194_s18, 1024  ;;  %s1095_s30 = smov [#allocation2]  }
  0x38   : > { %p1038_p1 = scmp.ne.s32.totalorder %s1194_s18, %s1037_s29  ;;  %s1042_s3 = sshll.u32 %s1095_s30, 4  ;;  %s1043_s3 = int_to_ptr.vmem [resolvable:$false] %s1042_s3 }
  0x39   : > { %s1044_s4 = scalar_lea.vmem %s1043_s3, 2048  ;;  %p1045_p10 = scmp.lt.s32.totalorder %s1194_s18, %s1043_s3 }
  0x3a   : > { %p1040_p4 = pnand %p1038_p1, %p1024_p11  ;;  %p1046_p12 = scmp.lt.s32.totalorder %s1044_s4, %s1037_s29 }
  0x3c   : > { %p1041_p5 = pneg %p1040_p4  ;;  %p1047_p0 = por %p1046_p12, %p1045_p10 }
  0x3e   : > { %p1048_p2 = pnand %p1047_p0, %p1041_p5 }
  0x40   : > { %1051 = shalt.err (!%p1048_p2)
}
  0x41   : > { %s1096_s5 = smov 128   ;;  %s1097_s7 = smov 8  }
  0x42   : > { %911 = dma.hbm_to_vmem [thread:$0]  (!%p1196_p7), %s1192_s23, 1024, %s1194_s18, %s1200_s12, %s1096_s5, %s1096_s5, %s1097_s7  }
  0x43   : > { %p1353_p11 = scmp.ne.s32.totalorder %s1350_s15, 0 }
  0x44   : > { %s145_s8 = sand.u32 (!%p1353_p11), 1, %s1082_s10   ;;  %p1354_p13 = scmp.ne.s32.totalorder (!%p1353_p11), %s1349_s14, 0 }
  0x45   : > { %143 = sbr.rel (%p1353_p11) target bundleno = 1246 (0x4de), region = 28  ;;  %s762_s9 = sshll.u32 (!%p1353_p11), %s145_s8, 6 }
  0x46   : > { %s146_s16 = scalar_lea.sflag (!%p1353_p11), [#allocation3], %s145_s8  ;;  %s1231_s22 = scalar_lea.vmem (!%p1353_p11), [#allocation2], %s762_s9 }
  0x4c   : > { %1069 = dma.done.wait (%p1354_p13), %s146_s16, 1024  }
  0x4d   : > { %1071 = vsyncadd (%p1354_p13), %s146_s16, 4294966272  ;;  %p1355_p3 = scmp.eq.s32.totalorder %s1134_s13, 0 }
  0x4f   : > { %1073 = dma.done.wait (%p1355_p3), [#allocation5], 1024   ;;  %p1356_p7 = pmov %p1355_p3 }
  0x50   : > { %v954_v0 = vld [vmem:[#allocation4] sm:$0xff]   ;;  %v955_v1 = vld [vmem:[#allocation4 + $0x8] sm:$0xff]   ;;  %v956_v2 = vld [vmem:[#allocation4 + $0x10] sm:$0xff]   ;;  %vm337_vm0 = vcmask 261120   ;;  %s1098_s14 = smov 96   ;;  %v427_v40 = vlaneseq  ;;  %vm454_vm3 = vcmask 523264  }
  0x51   : > { %1075 = vsyncadd (%p1356_p7), [#allocation5], 4294966272  ;;  %830 = vmatprep.subr.bf16.mxu0 %v954_v0  ;;  %v957_v3 = vld [vmem:[#allocation4 + $0x18] sm:$0xff]   ;;  %v180_v4 = vld [vmem:[%s1231_s22] sm:$0xff]  ;;  %s1099_s15 = smov 64   ;;  %p174_p6 = scmp.lt.s32.totalorder %s1134_s13, 1 }
  0x52   : > { %831 = vmatpush3.bf16.msra.mxu0 %v954_v0  ;;  %v181_v5 = vld [vmem:[%s1231_s22 + $0x8] sm:$0xff]  ;;  %v958_v7 = vld [vmem:[#allocation4 + $0x20] sm:$0xff]   ;;  %v960_v9 = vld [vmem:[#allocation4 + $0x30] sm:$0xff]   ;;  %v428_v41 = vshrl.u32 %v427_v40, 7  ;;  %v437_v43 = vand.u32 127, %v427_v40  ;;  %vm668_vm10 = vcmask 257024  }
  0x53   : > { %832 = vmatprep.subr.bf16.mxu0 %v955_v1  ;;  %v188_v6 = vpack.c.bf16 %v181_v5, %v180_v4  ;;  %v959_v8 = vld [vmem:[#allocation4 + $0x28] sm:$0xff]   ;;  %v961_v10 = vld [vmem:[#allocation4 + $0x38] sm:$0xff]   ;;  %v182_v11 = vld [vmem:[%s1231_s22 + $0x10] sm:$0xff]  ;;  %s1362_s13 = smov (!%p174_p6, %s1134_s13), 1 }
  0x54   : > { %v183_v12 = vld [vmem:[%s1231_s22 + $0x18] sm:$0xff]  ;;  %v184_v13 = vld [vmem:[%s1231_s22 + $0x20] sm:$0xff]  ;;  %v185_v14 = vld [vmem:[%s1231_s22 + $0x28] sm:$0xff]  ;;  %v430_v42 = vadd.s32 16, %v428_v41  ;;  %v431_v44 = vadd.s32 24, %v428_v41  ;;  %v429_v45 = vadd.s32 8, %v428_v41  ;;  %vm438_vm2 = vcmp.ge.s32.totalorder %v428_v41, %v437_v43 }
  0x55   : > { %846 = vmatprep.mubr.bf16.mxu0 %v188_v6  ;;  %v189_v15 = vpack.c.bf16 %v183_v12, %v182_v11  ;;  %v190_v16 = vpack.c.bf16 %v185_v14, %v184_v13  ;;  %v186_v17 = vld [vmem:[%s1231_s22 + $0x30] sm:$0xff]  ;;  %v187_v18 = vld [vmem:[%s1231_s22 + $0x38] sm:$0xff]  ;;  %v434_v52 = vadd.s32 48, %v428_v41  ;;  %v432_v55 = vadd.s32 32, %v428_v41  ;;  %s793_s23 = sshll.u32 %s1362_s13, 5 }
  0x56   : > { %833 = vmatpush3.bf16.msra.mxu0 %v955_v1  ;;  %v191_v19 = vpack.c.bf16 %v187_v18, %v186_v17  ;;  %vm440_vm1 = vcmp.ge.s32.totalorder %v430_v42, %v437_v43  ;;  %vm441_vm4 = vcmp.ge.s32.totalorder %v431_v44, %v437_v43  ;;  %vm439_vm5 = vcmp.ge.s32.totalorder %v429_v45, %v437_v43  ;;  %s178_s20 = scalar_lea.vmem %s1345_s2, %s793_s23 }
  0x57   : > { %834 = vmatprep.subr.bf16.mxu0 %v956_v2  ;;  %v433_v59 = vadd.s32 40, %v428_v41  ;;  %vm444_vm6 = vcmp.ge.s32.totalorder %v434_v52, %v437_v43  ;;  %vm442_vm7 = vcmp.ge.s32.totalorder %v432_v55, %v437_v43  ;;  %v435_v0 = vadd.s32 56, %v428_v41 }
  0x59   : > { %vm443_vm8 = vcmp.ge.s32.totalorder %v433_v59, %v437_v43  ;;  %vm445_vm9 = vcmp.ge.s32.totalorder %v435_v0, %v437_v43 }
  0x5a   : > { %835 = vmatpush3.bf16.msra.mxu0 %v956_v2 }
  0x5b   : > { %836 = vmatprep.subr.bf16.mxu0 %v957_v3 }
  0x5e   : > { %837 = vmatpush3.bf16.msra.mxu0 %v957_v3 }
  0x5f   : > { %838 = vmatprep.subr.bf16.mxu0 %v958_v7 }
  0x62   : > { %839 = vmatpush3.bf16.msra.mxu0 %v958_v7 }
  0x63   : > { %840 = vmatprep.subr.bf16.mxu0 %v959_v8 }
  0x66   : > { %841 = vmatpush3.bf16.msra.mxu0 %v959_v8 }
  0x67   : > { %842 = vmatprep.subr.bf16.mxu0 %v960_v9 }
  0x6a   : > { %843 = vmatpush3.bf16.msra.mxu0 %v960_v9 }
  0x6b   : > { %844 = vmatprep.subr.bf16.mxu0 %v961_v10 }
  0x6e   : > { %845 = vmatpush3.bf16.msra.mxu0 %v961_v10 }
  0x71   : > { %847 = vmatmul.mubr.bf16.vlgmr.msra.gmra.mrb[0].mxu0 %v189_v15 }
  0x72   : > { %850 = vmatprep.mubr.bf16.mxu0 %v190_v16 }
  0x79   : > { %851 = vmatmul.mubr.bf16.gmra.mrb[4].mxu0 %v191_v19 }
 0x144   : > { %v848_v20 = vpop.f32.mrb[0].mxu0 }
 0x145   : > { %v290_v21 = vpop.f32.mrb[1].mxu0 }
 0x146   : > { %v849_v22 = vpop.f32.mrb[2].mxu0 }
 0x147   : > { %v1249_v23 = vpack.c.bf16 %v849_v22, %v848_v20  ;;  %v293_v24 = vpop.f32.mrb[3].mxu0 }
 0x148   : > { %v1251_v25 = vpack.c.bf16 %v293_v24, %v290_v21 }
 0x14a   : > { %329 = vrot.lane.b32.xlu0 %v1251_v25, %s1098_s14  ;;  %862 = vmatprep.mubr.msk.bf16.mxu1 %vm337_vm0, %v1251_v25 }
 0x14c   : > { %v852_v26 = vpop.f32.mrb[4].mxu0 }
 0x14d   : > { %v306_v27 = vpop.f32.mrb[5].mxu0 }
 0x14e   : > { %331 = vrot.lane.b32.xlu0 %v1249_v23, %s1098_s14  ;;  %v853_v28 = vpop.f32.mrb[6].mxu0 }
 0x14f   : > { %v1257_v29 = vpack.c.bf16 %v853_v28, %v852_v26  ;;  %v309_v30 = vpop.f32.mrb[7].mxu0 }
 0x150   : > { %v1259_v31 = vpack.c.bf16 %v309_v30, %v306_v27 }
 0x152   : > { %333 = vrot.lane.b32.xlu1 %v1259_v31, %s1098_s14 }
 0x156   : > { %335 = vrot.lane.b32.xlu1 %v1257_v29, %s1098_s14 }
 0x1bc   : > { %v330_v32 = vpop.permute.xlu0 %329 }
 0x1bd   : > { %894 = vmatprep.subr.msk.bf16.mxu1 %vm337_vm0, %v330_v32  ;;  %v351_v33 = vsel %vm337_vm0, %v330_v32, 0 }
 0x1be   : > { %855 = vmatpush3.bf16.xpose.msra.mxu1 %v351_v33 }
 0x1c0   : > { %v332_v34 = vpop.permute.xlu0 %331 }
 0x1c1   : > { %895 = vmatprep.subr.msk.bf16.mxu1 %vm337_vm0, %v332_v34  ;;  %v354_v35 = vsel %vm337_vm0, %v332_v34, 0 }
 0x1c4   : > { %v334_v36 = vpop.permute.xlu1 %333 }
 0x1c5   : > { %v357_v37 = vsel %vm337_vm0, %v334_v36, 0 }
 0x1c6   : > { %857 = vmatpush3.bf16.xpose.msra.mxu1 %v354_v35 }
 0x1c7   : > { %896 = vmatprep.subr.msk.bf16.mxu1 %vm337_vm0, %v334_v36 }
 0x1c8   : > { %v336_v38 = vpop.permute.xlu1 %335 }
 0x1c9   : > { %v360_v39 = vsel %vm337_vm0, %v336_v38, 0 }
 0x1ce   : > { %859 = vmatpush3.bf16.xpose.msra.mxu1 %v357_v37 }
 0x1cf   : > { %897 = vmatprep.subr.msk.bf16.mxu1 %vm337_vm0, %v336_v38 }
 0x1d6   : > { %861 = vmatpush3.bf16.xpose.msra.mxu1 %v360_v39 }
 0x1dd   : > { %863 = vmatmul.mubr.msk.bf16.vlgmr.msra.gmra.mrb[0].mxu1 %vm337_vm0, %v1249_v23 }
 0x1de   : > { %866 = vmatprep.mubr.msk.bf16.mxu1 %vm337_vm0, %v1259_v31 }
 0x1e5   : > { %867 = vmatmul.mubr.msk.bf16.gmra.mrb[4].mxu1 %vm337_vm0, %v1257_v29 }
 0x2b0   : > { %v864_v46 = vpop.f32.mrb[0].mxu1 }
 0x2b1   : > { %v448_v47 = vsel %vm440_vm1, %v864_v46, -1e+30  ;;  %v396_v48 = vpop.f32.mrb[1].mxu1 }
 0x2b2   : > { %v446_v49 = vsel %vm438_vm2, %v396_v48, -1e+30  ;;  %v865_v50 = vpop.f32.mrb[2].mxu1  ;;  %v461_v51 = vsel %vm454_vm3, %v448_v47, -inf }
 0x2b3   : > { %462 = vmax.xlane.f32.xlu1 %v461_v51  ;;  %v399_v53 = vpop.f32.mrb[3].mxu1  ;;  %v455_v54 = vsel %vm454_vm3, %v446_v49, -inf  ;;  %v449_v56 = vsel %vm441_vm4, %v865_v50, -1e+30 }
 0x2b4   : > { %v447_v57 = vsel %vm439_vm5, %v399_v53, -1e+30  ;;  %456 = vmax.xlane.f32.xlu0 %v455_v54  ;;  %v464_v60 = vsel %vm454_vm3, %v449_v56, -inf }
 0x2b5   : > { %v458_v58 = vsel %vm454_vm3, %v447_v57, -inf }
 0x2b7   : > { %459 = vmax.xlane.f32.xlu1 %v458_v58 }
 0x2b8   : > { %465 = vmax.xlane.f32.xlu0 %v464_v60  ;;  %v868_v61 = vpop.f32.mrb[4].mxu1 }
 0x2b9   : > { %v452_v62 = vsel %vm444_vm6, %v868_v61, -1e+30  ;;  %v412_v63 = vpop.f32.mrb[5].mxu1 }
 0x2ba   : > { %v450_v1 = vsel %vm442_vm7, %v412_v63, -1e+30  ;;  %v869_v2 = vpop.f32.mrb[6].mxu1  ;;  %v473_v3 = vsel %vm454_vm3, %v452_v62, -inf }
 0x2bb   : > { %474 = vmax.xlane.f32.xlu1 %v473_v3  ;;  %v415_v4 = vpop.f32.mrb[7].mxu1  ;;  %v467_v5 = vsel %vm454_vm3, %v450_v1, -inf  ;;  %v453_v8 = vsel %vm445_vm9, %v869_v2, -1e+30 }
 0x2bc   : > { %v451_v6 = vsel %vm443_vm8, %v415_v4, -1e+30  ;;  %468 = vmax.xlane.f32.xlu0 %v467_v5  ;;  %v476_v9 = vsel %vm454_vm3, %v453_v8, -inf }
 0x2bd   : > { %v470_v7 = vsel %vm454_vm3, %v451_v6, -inf }
 0x2c0   : > { %471 = vmax.xlane.f32.xlu0 %v470_v7 }
 0x2c4   : > { %477 = vmax.xlane.f32.xlu0 %v476_v9 }
 0x2cc   : > { %547 = vrot.lane.b32.xlu1 %v1251_v25, %s1099_s15 }
 0x340   : > { %v463_v10 = vpop.xlane.xlu1 %462 }
 0x341   : > { %v481_v11 = vsub.f32 %v448_v47, %v463_v10  ;;  %v457_v12 = vpop.xlane.xlu0 %456 }
 0x342   : > { %v479_v13 = vsub.f32 %v446_v49, %v457_v12 }
 0x343   : > { %v491_v14 = vmul.f32 1.442695, %v481_v11 }
 0x344   : > { %v487_v15 = vmul.f32 1.442695, %v479_v13  ;;  %v460_v16 = vpop.xlane.xlu1 %459 }
 0x345   : > { %962 = vpow2.f32 %v491_v14  ;;  %v480_v17 = vsub.f32 %v447_v57, %v460_v16  ;;  %v466_v18 = vpop.xlane.xlu0 %465 }
 0x346   : > { %v482_v19 = vsub.f32 %v449_v56, %v466_v18  ;;  %964 = vpow2.f32 %v487_v15 }
 0x347   : > { %v489_v20 = vmul.f32 1.442695, %v480_v17 }
 0x348   : > { %v493_v21 = vmul.f32 1.442695, %v482_v19  ;;  %v475_v22 = vpop.xlane.xlu1 %474 }
 0x349   : > { %v485_v24 = vsub.f32 %v452_v62, %v475_v22  ;;  %v469_v26 = vpop.xlane.xlu0 %468 }
 0x34a   : > { %966 = vpow2.f32 %v493_v21  ;;  %v483_v27 = vsub.f32 %v450_v1, %v469_v26 }
 0x34b   : > { %v499_v25 = vmul.f32 1.442695, %v485_v24  ;;  %968 = vpow2.f32 %v489_v20 }
 0x34c   : > { %v495_v28 = vmul.f32 1.442695, %v483_v27  ;;  %v548_v30 = vpop.permute.xlu1 %547 }
 0x34d   : > { %970 = vpow2.f32 %v499_v25  ;;  %870 = vmatprep.subr.bf16.mxu0 %v548_v30  ;;  %886 = vmatprep.subr.bf16.mxu1 %v548_v30  ;;  %v472_v32 = vpop.xlane.xlu0 %471 }
 0x34e   : > { %871 = vmatpush3.bf16.msra.mxu0 %v548_v30  ;;  %890 = vmatpush3.bf16.msra.mxu1 %v548_v30  ;;  %972 = vpow2.f32 %v495_v28  ;;  %v484_v34 = vsub.f32 %v451_v6, %v472_v32 }
 0x34f   : > { %v1287_v33 = vpop.eup %962 }
 0x350   : > { %v509_v35 = vsel %vm454_vm3, %v1287_v33, 0.0  ;;  %v965_v36 = vpop.eup %964  ;;  %v497_v40 = vmul.f32 1.442695, %v484_v34 }
 0x351   : > { %510 = vadd.xlane.f32.xlu1 %v509_v35  ;;  %v478_v37 = vpop.xlane.xlu0 %477  ;;  %v503_v42 = vsel %vm454_vm3, %v965_v36, 0.0 }
 0x352   : > { %v486_v38 = vsub.f32 %v453_v8, %v478_v37 }
 0x354   : > { %v1291_v39 = vpop.eup %966  ;;  %v501_v41 = vmul.f32 1.442695, %v486_v38 }
 0x355   : > { %504 = vadd.xlane.f32.xlu1 %v503_v42  ;;  %v512_v43 = vsel %vm454_vm3, %v1291_v39, 0.0  ;;  %v969_v44 = vpop.eup %968 }
 0x356   : > { %974 = vpow2.f32 %v501_v41  ;;  %513 = vadd.xlane.f32.xlu0 %v512_v43  ;;  %v506_v48 = vsel %vm454_vm3, %v969_v44, 0.0 }
 0x357   : > { %v1296_v45 = vpop.eup %970  ;;  %976 = vpow2.f32 %v497_v40 }
 0x358   : > { %v521_v46 = vsel %vm454_vm3, %v1296_v45, 0.0  ;;  %v973_v47 = vpop.eup %972 }
 0x359   : > { %522 = vadd.xlane.f32.xlu1 %v521_v46  ;;  %v515_v49 = vsel %vm454_vm3, %v973_v47, 0.0 }
 0x35a   : > { %507 = vadd.xlane.f32.xlu0 %v506_v48 }
 0x35d   : > { %516 = vadd.xlane.f32.xlu1 %v515_v49 }
 0x360   : > { %v975_v50 = vpop.eup %974 }
 0x361   : > { %v524_v51 = vsel %vm454_vm3, %v975_v50, 0.0  ;;  %v977_v52 = vpop.eup %976 }
 0x362   : > { %525 = vadd.xlane.f32.xlu0 %v524_v51  ;;  %v518_v53 = vsel %vm454_vm3, %v977_v52, 0.0 }
 0x366   : > { %519 = vadd.xlane.f32.xlu0 %v518_v53 }
 0x36e   : > { %551 = vrot.lane.b32.xlu1 %v1259_v31, %s1099_s15 }
 0x372   : > { %553 = vrot.lane.b32.xlu1 %v1257_v29, %s1099_s15 }
 0x37c   : > { %549 = vrot.lane.b32.xlu0 %v1249_v23, %s1099_s15 }
 0x3de   : > { %v511_v54 = vpop.xlane.xlu1 %510 }
 0x3e2   : > { %v505_v55 = vpop.xlane.xlu1 %504 }
 0x3e3   : > { %v514_v56 = vpop.xlane.xlu0 %513  ;;  %978 = vrcp.f32 %v505_v55 }
 0x3e6   : > { %v523_v58 = vpop.xlane.xlu1 %522 }
 0x3e7   : > { %v508_v57 = vpop.xlane.xlu0 %507 }
 0x3e8   : > { %980 = vrcp.f32 %v508_v57 }
 0x3e9   : > { %982 = vrcp.f32 %v511_v54 }
 0x3ea   : > { %v517_v59 = vpop.xlane.xlu1 %516  ;;  %984 = vrcp.f32 %v514_v56 }
 0x3ed   : > { %v979_v61 = vpop.eup %978 }
 0x3ee   : > { %v535_v62 = vmul.f32 %v979_v61, %v965_v36  ;;  %v552_v0 = vpop.permute.xlu1 %551 }
 0x3ef   : > { %v526_v60 = vpop.xlane.xlu0 %525 }
 0x3f0   : > { %986 = vrcp.f32 %v526_v60 }
 0x3f1   : > { %988 = vrcp.f32 %v517_v59 }
 0x3f2   : > { %v981_v31 = vpop.eup %980  ;;  %990 = vrcp.f32 %v523_v58  ;;  %v554_v7 = vpop.permute.xlu1 %553 }
 0x3f3   : > { %v520_v29 = vpop.xlane.xlu0 %519  ;;  %v536_v63 = vmul.f32 %v981_v31, %v969_v44  ;;  %v983_v2 = vpop.eup %982 }
 0x3f4   : > { %992 = vrcp.f32 %v520_v29  ;;  %v985_v3 = vpop.eup %984  ;;  %v537_v13 = vmul.f32 %v983_v2, %v1287_v33 }
 0x3f5   : > { %v543_v23 = vpack.c.bf16 %v536_v63, %v535_v62  ;;  %v538_v9 = vmul.f32 %v985_v3, %v1291_v39 }
 0x3f7   : > { %878 = vmatprep.mubr.msk.bf16.mxu0 %vm454_vm3, %v543_v23  ;;  %v550_v1 = vpop.permute.xlu0 %549  ;;  %v544_v16 = vpack.c.bf16 %v538_v9, %v537_v13 }
 0x3f8   : > { %872 = vmatprep.subr.bf16.mxu0 %v550_v1  ;;  %887 = vmatprep.subr.bf16.mxu1 %v550_v1 }
 0x3f9   : > { %873 = vmatpush3.bf16.msra.mxu0 %v550_v1  ;;  %891 = vmatpush3.bf16.msra.mxu1 %v550_v1 }
 0x3fa   : > { %874 = vmatprep.subr.bf16.mxu0 %v552_v0  ;;  %888 = vmatprep.subr.bf16.mxu1 %v552_v0  ;;  %v987_v4 = vpop.eup %986 }
 0x3fb   : > { %v989_v5 = vpop.eup %988  ;;  %v542_v10 = vmul.f32 %v987_v4, %v975_v50 }
 0x3fc   : > { %v991_v6 = vpop.eup %990  ;;  %v539_v11 = vmul.f32 %v989_v5, %v973_v47 }
 0x3fd   : > { %875 = vmatpush3.bf16.msra.mxu0 %v552_v0  ;;  %892 = vmatpush3.bf16.msra.mxu1 %v552_v0  ;;  %v541_v14 = vmul.f32 %v991_v6, %v1296_v45 }
 0x3fe   : > { %v993_v8 = vpop.eup %992  ;;  %876 = vmatprep.subr.bf16.mxu0 %v554_v7  ;;  %889 = vmatprep.subr.bf16.mxu1 %v554_v7 }
 0x3ff   : > { %v540_v12 = vmul.f32 %v993_v8, %v977_v52  ;;  %v546_v17 = vpack.c.bf16 %v542_v10, %v541_v14 }
 0x401   : > { %877 = vmatpush3.bf16.msra.mxu0 %v554_v7  ;;  %893 = vmatpush3.bf16.msra.mxu1 %v554_v7  ;;  %v545_v15 = vpack.c.bf16 %v540_v12, %v539_v11 }
 0x403   : > { %882 = vmatprep.mubr.msk.bf16.mxu1 %vm454_vm3, %v545_v15 }
 0x404   : > { %879 = vmatmul.mubr.msk.bf16.vlgmr.msra.gmra.mrb[8].mxu0 %vm454_vm3, %v544_v16  ;;  %883 = vmatmul.mubr.msk.bf16.vlgmr.msra.gmra.mrb[8].mxu1 %vm454_vm3, %v546_v17 }
 0x4d7   : > { %v880_v18 = vpop.f32.mrb[8].mxu0  ;;  %v884_v19 = vpop.f32.mrb[8].mxu1 }
 0x4d8   : > { %v796_v20 = vpack.c.bf16 %v880_v18, %v880_v18  ;;  %v800_v21 = vpack.c.bf16 %v884_v19, %v884_v19  ;;  %v605_v22 = vpop.f32.mrb[9].mxu0  ;;  %v621_v24 = vpop.f32.mrb[9].mxu1 }
 0x4d9   : > { %v794_v26 = vpack.c.bf16 %v605_v22, %v605_v22  ;;  %v798_v27 = vpack.c.bf16 %v621_v24, %v621_v24  ;;  %v881_v25 = vpop.f32.mrb[10].mxu0  ;;  %v885_v28 = vpop.f32.mrb[10].mxu1 }
 0x4da   : > { %671 = vst.msk [vmem:[%s178_s20 + $0x8] sm:$0xf] %vm668_vm10, %v796_v20  ;;  %675 = vst.msk [vmem:[%s178_s20 + $0x18] sm:$0xf] %vm668_vm10, %v800_v21  ;;  %v797_v30 = vpack.c.bf16 %v881_v25, %v881_v25  ;;  %v801_v32 = vpack.c.bf16 %v885_v28, %v885_v28  ;;  %v608_v33 = vpop.f32.mrb[11].mxu0  ;;  %v624_v34 = vpop.f32.mrb[11].mxu1 }
 0x4db   : > { %669 = vst.msk [vmem:[%s178_s20] sm:$0xf] %vm668_vm10, %v794_v26  ;;  %673 = vst.msk [vmem:[%s178_s20 + $0x10] sm:$0xf] %vm668_vm10, %v798_v27  ;;  %v795_v35 = vpack.c.bf16 %v608_v33, %v608_v33  ;;  %v799_v36 = vpack.c.bf16 %v624_v34, %v624_v34 }
 0x4dc   : > { %672 = vst.msk [vmem:[%s178_s20 + $0xc] sm:$0xf] %vm668_vm10, %v797_v30  ;;  %676 = vst.msk [vmem:[%s178_s20 + $0x1c] sm:$0xf] %vm668_vm10, %v801_v32 }
 0x4dd   : > { %670 = vst.msk [vmem:[%s178_s20 + $0x4] sm:$0xf] %vm668_vm10, %v795_v35  ;;  %674 = vst.msk [vmem:[%s178_s20 + $0x14] sm:$0xf] %vm668_vm10, %v799_v36 }
 0x4de PF: > { %p13_p8 = scmp.ge.s32.totalorder %s1159_s19, 4   ;;  %s1357_s9 = smov %s1082_s10 }
 0x4df   : > { %s1358_s10 = smov %s1086_s11  ;;  %s1359_s11 = smov %s1185_s6 }
 0x4e0   : > { %s1360_s12 = smov %s1159_s19  ;;  %15 = sbr.rel (!%p13_p8) target bundleno = 4 (0x4), region = 72 }
 0x4e7   :  { %698 = vsyncpa [#allocation3], 1 }
 0x4e8   :  { %700 = vsyncpa [#allocation3 + $0x1], 1 }
 0x4e9   :  { %701 = vsyncpa [#allocation5], 1 }

</bundles_post_ra>
